<compile_context>
chip_gen: v7x
topology: tpu7x:2x2x1
jax: 0.10.0
libtpu: 0.0.40
codegen_flags: <defaults>
</compile_context>

<pallas_src>
import jax
import jax.numpy as jnp
from jax.experimental import pallas as pl
from jax.experimental.pallas import tpu as pltpu

D = 768        # transformer hidden size (fixed by the module's Linear layers)
H = 256        # classifier hidden size

_BLOCK_BUDGET = 8 << 20      # target bytes per streamed (TB, TS, D) block
_VMEM_LIMIT = 48 << 20       # explicit scoped-VMEM limit (safe on v5e/v6e/v7x)


# ---------------------------------------------------------------------------
# Tiling helpers
# ---------------------------------------------------------------------------
def _choose_tiles(B, S, itemsize, budget=_BLOCK_BUDGET, tb_cap=32):
    """Pick (TB, TS) for the streamed (B, S, D) tensor.

    TB is a multiple of 8 (BlockSpec sublane rule) or the full batch; when
    B % 16 == 0 we guarantee >= 2 batch-grid steps so both v7x TensorCores
    stream.  TS is the largest multiple-of-8 divisor of S whose (TB, TS, D)
    block fits the byte budget, falling back to the full sequence (full-extent
    blocks are always legal, e.g. S=197 ViT sequences)."""
    if B % 16 == 0:
        tb = 8
        while tb * 2 <= tb_cap and B % (tb * 4) == 0:
            tb *= 2
    else:
        tb = B
    cap = max(8, budget // (tb * D * itemsize))
    divisors = [t for t in range(8, S + 1, 8) if S % t == 0 and t <= cap]
    ts = divisors[-1] if divisors else S
    return tb, ts


def _text_batch_tile(B):
    for cand in (256, 128, 64, 32, 16, 8):
        if B > cand and B % cand == 0:
            return cand
    return B


# ---------------------------------------------------------------------------
# Kernels
# ---------------------------------------------------------------------------
def _multimodal_kernel(img_ref, txt_ref, sen_ref, w_ref, b_ref, out_ref, mx_ref):
    """max-pool(image) over tiled seq (input dtype), CLS(text/senti),
    Linear(3*768 -> 1), sigmoid."""
    s = pl.program_id(1)

    @pl.when(s == 0)
    def _init():
        mx_ref[...] = jnp.full(mx_ref.shape, -jnp.inf, mx_ref.dtype)

    # Running max in the input dtype (exact; no f32 tile materialization).
    mx_ref[...] = jnp.maximum(mx_ref[...], jnp.max(img_ref[...], axis=1))

    @pl.when(s == pl.num_programs(1) - 1)
    def _finalize():
        w = w_ref[...]                                       # (3, D) f32, resident
        img_max = mx_ref[...].astype(jnp.float32)            # (TB, D)
        txt_cls = txt_ref[...].astype(jnp.float32)           # (TB, D)
        sen_cls = sen_ref[...].astype(jnp.float32)           # (TB, D)
        # lane-dense VPU mul + lane reduce instead of N=1 MXU matvecs
        logit = (jnp.sum(img_max * w[0:1, :], axis=-1, keepdims=True)
                 + jnp.sum(txt_cls * w[1:2, :], axis=-1, keepdims=True)
                 + jnp.sum(sen_cls * w[2:3, :], axis=-1, keepdims=True)
                 + b_ref[0])                                  # (TB, 1)
        out_ref[...] = jax.nn.sigmoid(logit)


def _image_kernel(img_ref, w1_ref, b1_ref, w2_ref, b2_ref, out_ref, mx_ref):
    """max-pool over tiled seq (input dtype), Linear(D->H), [Dropout=id],
    Linear(H->1), tanh, sigmoid."""
    s = pl.program_id(1)

    @pl.when(s == 0)
    def _init():
        mx_ref[...] = jnp.full(mx_ref.shape, -jnp.inf, mx_ref.dtype)

    mx_ref[...] = jnp.maximum(mx_ref[...], jnp.max(img_ref[...], axis=1))

    @pl.when(s == pl.num_programs(1) - 1)
    def _finalize():
        pooled = mx_ref[...].astype(jnp.float32)                         # (TB, D)
        h = jnp.dot(pooled, w1_ref[...],
                    preferred_element_type=jnp.float32) + b1_ref[...]    # (TB, H)
        o = jnp.tanh(jnp.sum(h * w2_ref[...], axis=-1, keepdims=True)
                     + b2_ref[0])                                        # (TB, 1)
        out_ref[...] = jax.nn.sigmoid(o)


def _text_kernel(cls_ref, w1_ref, b1_ref, w2_ref, b2_ref, out_ref):
    """CLS token (pre-sliced in wrapper), Linear(D->H), [Dropout=id],
    Linear(H->1), tanh, sigmoid."""
    cls_tok = cls_ref[...].astype(jnp.float32)                           # (TB, D)
    h = jnp.dot(cls_tok, w1_ref[...],
                preferred_element_type=jnp.float32) + b1_ref[...]        # (TB, H)
    o = jnp.tanh(jnp.sum(h * w2_ref[...], axis=-1, keepdims=True)
                 + b2_ref[0])                                            # (TB, 1)
    out_ref[...] = jax.nn.sigmoid(o)


# ---------------------------------------------------------------------------
# Wrappers (pallas_call plumbing)
# ---------------------------------------------------------------------------
def multimodal_forward(img_feats, txt_feats, sen_feats, params, *, seq_tile=None):
    """image_input, text_input, senti_input all present -> classifier_all branch."""
    B, S, _ = img_feats.shape
    # Only CLS rows of text / senti cross the pallas boundary; keep them f32.
    txt_cls = txt_feats[:, 0, :].astype(jnp.float32)
    sen_cls = sen_feats[:, 0, :].astype(jnp.float32)

    TB, TS = _choose_tiles(B, S, jnp.dtype(img_feats.dtype).itemsize)
    if seq_tile is not None:
        TS = seq_tile
    assert B % TB == 0 and S % TS == 0

    out = pl.pallas_call(
        _multimodal_kernel,
        out_shape=jax.ShapeDtypeStruct((B, 1), jnp.float32),
        grid=(B // TB, S // TS),
        in_specs=[
            pl.BlockSpec((TB, TS, D), lambda i, s: (i, s, 0)),
            pl.BlockSpec((TB, D), lambda i, s: (i, 0)),
            pl.BlockSpec((TB, D), lambda i, s: (i, 0)),
            pl.BlockSpec((3, D), lambda i, s: (0, 0)),
            pl.BlockSpec(memory_space=pltpu.MemorySpace.SMEM),
        ],
        out_specs=pl.BlockSpec((TB, 1), lambda i, s: (i, 0)),
        scratch_shapes=[pltpu.VMEM((TB, D), img_feats.dtype)],
        compiler_params=pltpu.CompilerParams(
            dimension_semantics=("parallel", "arbitrary"),
            vmem_limit_bytes=_VMEM_LIMIT),
    )(img_feats, txt_cls, sen_cls, params["w_all"], params["b_all"])
    return out[:, 0]                                        # .squeeze(1)


def image_only_forward(img_feats, params, *, seq_tile=None):
    B, S, _ = img_feats.shape
    TB, TS = _choose_tiles(B, S, jnp.dtype(img_feats.dtype).itemsize)
    if seq_tile is not None:
        TS = seq_tile
    assert B % TB == 0 and S % TS == 0

    out = pl.pallas_call(
        _image_kernel,
        out_shape=jax.ShapeDtypeStruct((B, 1), jnp.float32),
        grid=(B // TB, S // TS),
        in_specs=[
            pl.BlockSpec((TB, TS, D), lambda i, s: (i, s, 0)),
            pl.BlockSpec((D, H), lambda i, s: (0, 0)),
            pl.BlockSpec((1, H), lambda i, s: (0, 0)),
            pl.BlockSpec((1, H), lambda i, s: (0, 0)),
            pl.BlockSpec(memory_space=pltpu.MemorySpace.SMEM),
        ],
        out_specs=pl.BlockSpec((TB, 1), lambda i, s: (i, 0)),
        scratch_shapes=[pltpu.VMEM((TB, D), img_feats.dtype)],
        compiler_params=pltpu.CompilerParams(
            dimension_semantics=("parallel", "arbitrary"),
            vmem_limit_bytes=_VMEM_LIMIT),
    )(img_feats, params["wi1"], params["bi1"], params["wi2"], params["bi2"])
    return out[:, 0]


def text_only_forward(txt_feats, params):
    cls_tok = txt_feats[:, 0, :].astype(jnp.float32)   # only CLS rows move
    B = cls_tok.shape[0]
    TB = _text_batch_tile(B)

    out = pl.pallas_call(
        _text_kernel,
        out_shape=jax.ShapeDtypeStruct((B, 1), jnp.float32),
        grid=(B // TB,),
        in_specs=[
            pl.BlockSpec((TB, D), lambda i: (i, 0)),
            pl.BlockSpec((D, H), lambda i: (0, 0)),
            pl.BlockSpec((1, H), lambda i: (0, 0)),
            pl.BlockSpec((1, H), lambda i: (0, 0)),
            pl.BlockSpec(memory_space=pltpu.MemorySpace.SMEM),
        ],
        out_specs=pl.BlockSpec((TB, 1), lambda i: (i, 0)),
        compiler_params=pltpu.CompilerParams(
            dimension_semantics=("parallel",),
            vmem_limit_bytes=_VMEM_LIMIT),
    )(cls_tok, params["wt1"], params["bt1"], params["wt2"], params["bt2"])
    return out[:, 0]


# ---------------------------------------------------------------------------
# Deterministic parameter init + pure-JAX reference
# ---------------------------------------------------------------------------
def init_params(key):
    ks = jax.random.split(key, 8)
    s = 0.02
    return {
        # classifier_all: Linear(3*768 -> 1); rows of w_all = [image, text, senti]
        "w_all": s * jax.random.normal(ks[0], (3, D), jnp.float32),
        "b_all": s * jax.random.normal(ks[1], (1,), jnp.float32),
        # classifier_text: Linear(768->256), Dropout, Linear(256->1), Tanh
        "wt1": s * jax.random.normal(ks[2], (D, H), jnp.float32),
        "bt1": s * jax.random.normal(ks[3], (1, H), jnp.float32),
        "wt2": s * jax.random.normal(ks[4], (1, H), jnp.float32),
        "bt2": s * jax.random.normal(ks[5], (1,), jnp.float32),
        # classifier_image: Linear(768->256), Dropout, Linear(256->1), Tanh
        "wi1": s * jax.random.normal(ks[6], (D, H), jnp.float32),
        "bi1": jnp.zeros((1, H), jnp.float32),
        "wi2": s * jax.random.normal(ks[7], (1, H), jnp.float32),
        "bi2": jnp.zeros((1,), jnp.float32),
    }


def _ref_multimodal(img, txt, sen, p):
    pooled = jnp.max(img.astype(jnp.float32), axis=1)
    txt_cls = txt[:, 0, :].astype(jnp.float32)
    sen_cls = sen[:, 0, :].astype(jnp.float32)
    w = p["w_all"]
    logit = (jnp.sum(pooled * w[0], axis=-1)
             + jnp.sum(txt_cls * w[1], axis=-1)
             + jnp.sum(sen_cls * w[2], axis=-1)
             + p["b_all"][0])
    return jax.nn.sigmoid(logit)


def _ref_head(x, w1, b1, w2, b2, pool):
    xf = x.astype(jnp.float32)
    pooled = xf[:, 0, :] if pool == "cls" else jnp.max(xf, axis=1)
    h = jnp.dot(pooled, w1, preferred_element_type=jnp.float32) + b1
    o = jnp.tanh(jnp.sum(h * w2, axis=-1) + b2[0])
    return jax.nn.sigmoid(o)


if __name__ == "__main__":
    key = jax.random.PRNGKey(0)
    kp, k1, k2, k3 = jax.random.split(key, 4)
    params = init_params(kp)

    B, S_txt, S_img = 2, 8, 32
    # synthetic backbone outputs (stand-ins for bert/vit last_hidden_state), bf16
    txt_feats = jax.random.normal(k1, (B, S_txt, D), jnp.float32).astype(jnp.bfloat16)
    sen_feats = jax.random.normal(k2, (B, S_txt, D), jnp.float32).astype(jnp.bfloat16)
    img_feats = jax.random.normal(k3, (B, S_img, D), jnp.float32).astype(jnp.bfloat16)

    # multimodal branch: exercise the multi-step running-max path (4 seq tiles)
    out_all = jax.block_until_ready(
        multimodal_forward(img_feats, txt_feats, sen_feats, params, seq_tile=8))
    ref_all = _ref_multimodal(img_feats, txt_feats, sen_feats, params)

    # text-only branch (single batch step at this B)
    out_txt = jax.block_until_ready(text_only_forward(txt_feats, params))
    ref_txt = _ref_head(txt_feats, params["wt1"], params["bt1"],
                        params["wt2"], params["bt2"], "cls")

    # image-only branch: default tiling (single seq step) and explicit 2-step tiling
    out_img = jax.block_until_ready(image_only_forward(img_feats, params))
    out_img2 = jax.block_until_ready(
        image_only_forward(img_feats, params, seq_tile=16))
    ref_img = _ref_head(img_feats, params["wi1"], params["bi1"],
                        params["wi2"], params["bi2"], "max")

    assert out_all.shape == (B,) and out_txt.shape == (B,) and out_img.shape == (B,)
    assert jnp.allclose(out_all, ref_all, atol=2e-5), (out_all, ref_all)
    assert jnp.allclose(out_txt, ref_txt, atol=2e-5), (out_txt, ref_txt)
    assert jnp.allclose(out_img, ref_img, atol=2e-5), (out_img, ref_img)
    assert jnp.allclose(out_img2, ref_img, atol=2e-5), (out_img2, ref_img)

    print("KERNEL_OK")
</pallas_src>

<mosaic_0001>
module attributes {stable_mosaic.version = 11 : i64} {
  func.func @_multimodal_kernel(%arg0: i32, %arg1: i32, %arg2: memref<2x8x768xbf16, #tpu.memory_space<vmem>>, %arg3: memref<2x768xf32, #tpu.memory_space<vmem>>, %arg4: memref<2x768xf32, #tpu.memory_space<vmem>>, %arg5: memref<3x768xf32, #tpu.memory_space<vmem>>, %arg6: memref<1xf32, #tpu.memory_space<smem>>, %arg7: memref<2x1xf32, #tpu.memory_space<vmem>>, %arg8: memref<2x768xbf16, #tpu.memory_space<vmem>>) attributes {dimension_semantics = [#tpu.dimension_semantics<parallel>, #tpu.dimension_semantics<arbitrary>], iteration_bounds = array<i64: 1, 4>, scalar_prefetch = 0 : i64, scratch_operands = 1 : i64, tpu.core_type = #tpu.core_type<tc>, window_params = [{transform_indices = @transform_0, window_bounds = array<i64: 2, 8, 768>}, {transform_indices = @transform_1, window_bounds = array<i64: 2, 768>}, {transform_indices = @transform_2, window_bounds = array<i64: 2, 768>}, {pipeline_mode = #tpu.pipeline_mode<synchronous>, transform_indices = @transform_3, window_bounds = array<i64: 3, 768>}, {transform_indices = @transform_4, window_bounds = array<i64: 1>}, {transform_indices = @transform_5, window_bounds = array<i64: 2, 1>}]} {
    %c0_i32 = arith.constant 0 : i32
    %0 = arith.cmpi eq, %arg1, %c0_i32 : i32
    %1 = arith.extui %0 : i1 to i32
    %c0_i32_0 = arith.constant 0 : i32
    %2 = arith.cmpi ne, %1, %c0_i32_0 : i32
    scf.if %2 {
      %cst_8 = arith.constant 0xFF80 : bf16
      %11 = vector.broadcast %cst_8 : bf16 to vector<2x768xbf16>
      %c0_9 = arith.constant 0 : index
      %c0_10 = arith.constant 0 : index
      %12 = vector.load %arg8[%c0_9, %c0_10] : memref<2x768xbf16, #tpu.memory_space<vmem>>, vector<2x768xbf16>
      tpu.vector_store %arg8[%c0_9, %c0_10], %11 {strides = array<i32>} : memref<2x768xbf16, #tpu.memory_space<vmem>>, vector<2x768xbf16>,
    } else {
    }
    %c0 = arith.constant 0 : index
    %c0_1 = arith.constant 0 : index
    %3 = vector.load %arg8[%c0, %c0_1] : memref<2x768xbf16, #tpu.memory_space<vmem>>, vector<2x768xbf16>
    %c0_2 = arith.constant 0 : index
    %c0_3 = arith.constant 0 : index
    %c0_4 = arith.constant 0 : index
    %4 = vector.load %arg2[%c0_2, %c0_3, %c0_4] : memref<2x8x768xbf16, #tpu.memory_space<vmem>>, vector<2x8x768xbf16>
    %cst = arith.constant dense<0xFF80> : vector<2x768xbf16>
    %5 = vector.multi_reduction <maximumf>, %4, %cst [1] : vector<2x8x768xbf16> to vector<2x768xbf16>
    %6 = arith.maximumf %3, %5 : vector<2x768xbf16>
    %c0_5 = arith.constant 0 : index
    %c0_6 = arith.constant 0 : index
    %7 = vector.load %arg8[%c0_5, %c0_6] : memref<2x768xbf16, #tpu.memory_space<vmem>>, vector<2x768xbf16>
    tpu.vector_store %arg8[%c0_5, %c0_6], %6 {strides = array<i32>} : memref<2x768xbf16, #tpu.memory_space<vmem>>, vector<2x768xbf16>,
    %c3_i32 = arith.constant 3 : i32
    %8 = arith.cmpi eq, %arg1, %c3_i32 : i32
    %9 = arith.extui %8 : i1 to i32
    %c0_i32_7 = arith.constant 0 : i32
    %10 = arith.cmpi ne, %9, %c0_i32_7 : i32
    scf.if %10 {
      %c0_8 = arith.constant 0 : index
      %c0_9 = arith.constant 0 : index
      %11 = vector.load %arg5[%c0_8, %c0_9] : memref<3x768xf32, #tpu.memory_space<vmem>>, vector<3x768xf32>
      %c0_10 = arith.constant 0 : index
      %c0_11 = arith.constant 0 : index
      %12 = vector.load %arg8[%c0_10, %c0_11] : memref<2x768xbf16, #tpu.memory_space<vmem>>, vector<2x768xbf16>
      %13 = arith.extf %12 : vector<2x768xbf16> to vector<2x768xf32>
      %c0_12 = arith.constant 0 : index
      %c0_13 = arith.constant 0 : index
      %14 = vector.load %arg3[%c0_12, %c0_13] : memref<2x768xf32, #tpu.memory_space<vmem>>, vector<2x768xf32>
      %c0_14 = arith.constant 0 : index
      %c0_15 = arith.constant 0 : index
      %15 = vector.load %arg4[%c0_14, %c0_15] : memref<2x768xf32, #tpu.memory_space<vmem>>, vector<2x768xf32>
      %16 = vector.extract_strided_slice %11 {offsets = [0, 0], sizes = [1, 768], strides = [1, 1]} : vector<3x768xf32> to vector<1x768xf32>
      %17 = vector.broadcast %16 : vector<1x768xf32> to vector<2x768xf32>
      %18 = arith.mulf %13, %17 : vector<2x768xf32>
      %cst_16 = arith.constant dense<0.000000e+00> : vector<2xf32>
      %19 = vector.multi_reduction <add>, %18, %cst_16 [1] : vector<2x768xf32> to vector<2xf32>
      %20 = vector.shape_cast %19 : vector<2xf32> to vector<2x1xf32>
      %21 = vector.extract_strided_slice %11 {offsets = [1, 0], sizes = [1, 768], strides = [1, 1]} : vector<3x768xf32> to vector<1x768xf32>
      %22 = vector.broadcast %21 : vector<1x768xf32> to vector<2x768xf32>
      %23 = arith.mulf %14, %22 : vector<2x768xf32>
      %cst_17 = arith.constant dense<0.000000e+00> : vector<2xf32>
      %24 = vector.multi_reduction <add>, %23, %cst_17 [1] : vector<2x768xf32> to vector<2xf32>
      %25 = vector.shape_cast %24 : vector<2xf32> to vector<2x1xf32>
      %26 = arith.addf %20, %25 : vector<2x1xf32>
      %27 = vector.extract_strided_slice %11 {offsets = [2, 0], sizes = [1, 768], strides = [1, 1]} : vector<3x768xf32> to vector<1x768xf32>
      %28 = vector.broadcast %27 : vector<1x768xf32> to vector<2x768xf32>
      %29 = arith.mulf %15, %28 : vector<2x768xf32>
      %cst_18 = arith.constant dense<0.000000e+00> : vector<2xf32>
      %30 = vector.multi_reduction <add>, %29, %cst_18 [1] : vector<2x768xf32> to vector<2xf32>
      %31 = vector.shape_cast %30 : vector<2xf32> to vector<2x1xf32>
      %32 = arith.addf %26, %31 : vector<2x1xf32>
      %c0_19 = arith.constant 0 : index
      %33 = memref.load %arg6[%c0_19] : memref<1xf32, #tpu.memory_space<smem>>
      %34 = vector.broadcast %33 : f32 to vector<2x1xf32>
      %35 = arith.addf %32, %34 : vector<2x1xf32>
      %36 = arith.negf %35 : vector<2x1xf32>
      %37 = math.exp %36 : vector<2x1xf32>
      %cst_20 = arith.constant 1.000000e+00 : f32
      %38 = vector.broadcast %cst_20 : f32 to vector<2x1xf32>
      %39 = arith.addf %38, %37 : vector<2x1xf32>
      %40 = arith.divf %38, %39 : vector<2x1xf32>
      %c0_21 = arith.constant 0 : index
      %c0_22 = arith.constant 0 : index
      %41 = vector.load %arg7[%c0_21, %c0_22] : memref<2x1xf32, #tpu.memory_space<vmem>>, vector<2x1xf32>
      tpu.vector_store %arg7[%c0_21, %c0_22], %40 {strides = array<i32>} : memref<2x1xf32, #tpu.memory_space<vmem>>, vector<2x1xf32>,
    } else {
    }
    return
  }
  func.func @transform_0(%arg0: i32, %arg1: i32) -> (i32, i32, i32) {
    %c0_i32 = arith.constant 0 : i32
    %c0_i32_0 = arith.constant 0 : i32
    return %arg0, %arg1, %c0_i32 : i32, i32, i32
  }
  func.func @transform_1(%arg0: i32, %arg1: i32) -> (i32, i32) {
    %c0_i32 = arith.constant 0 : i32
    %c0_i32_0 = arith.constant 0 : i32
    return %arg0, %c0_i32 : i32, i32
  }
  func.func @transform_2(%arg0: i32, %arg1: i32) -> (i32, i32) {
    %c0_i32 = arith.constant 0 : i32
    %c0_i32_0 = arith.constant 0 : i32
    return %arg0, %c0_i32 : i32, i32
  }
  func.func @transform_3(%arg0: i32, %arg1: i32) -> (i32, i32) {
    %c0_i32 = arith.constant 0 : i32
    %c0_i32_0 = arith.constant 0 : i32
    %c0_i32_1 = arith.constant 0 : i32
    return %c0_i32, %c0_i32_0 : i32, i32
  }
  func.func @transform_4(%arg0: i32, %arg1: i32) -> i32 {
    %c0_i32 = arith.constant 0 : i32
    %c0_i32_0 = arith.constant 0 : i32
    return %c0_i32 : i32
  }
  func.func @transform_5(%arg0: i32, %arg1: i32) -> (i32, i32) {
    %c0_i32 = arith.constant 0 : i32
    %c0_i32_0 = arith.constant 0 : i32
    return %arg0, %c0_i32 : i32, i32
  }
}

</mosaic_0001>

<bundles_post_ra>
// kernel: tpu_custom_call.1
= control target key start
LH: loop header
LB: loop body
LE: loop exit
PB: predicated region body
PF: predicated region fallthrough
CT: control target
= control target key end

     0   :  { %s1997_s0 = inlined_call_operand.hbm [shape: bf16[2,32,768], index: 0, kind: input, shape index: {}]   ;;  %s1998_s1 = inlined_call_operand.hbm [shape: f32[2,768], index: 1, kind: input, shape index: {}]   ;;  %s1999_s2 = inlined_call_operand.hbm [shape: f32[2,768], index: 2, kind: input, shape index: {}]   ;;  %s2000_s3 = inlined_call_operand.hbm [shape: f32[3,768], index: 3, kind: input, shape index: {}]   ;;  %s2001_s4 = inlined_call_operand.<no memory space> [shape: f32[1], index: 4, kind: input, shape index: {}]   ;;  %s2002_s5 = inlined_call_operand.vmem [shape: f32[2,1], index: 5, kind: output, shape index: {}]  }
   0x1   :  { %10 = sst [smem:[#allocation3]] %s2001_s4 }
   0x2   :  { %11 = vsyncpa [#allocation5], 0 }
   0x3   :  { %13 = vsyncpa [#allocation5 + $0x1], 0 }
   0x4   :  { %14 = vsyncpa [#allocation7], 0 }
   0x5   :  { %15 = vsyncpa [#allocation10], 0  ;;  %s1654_s20 = smov 0   ;;  %s1656_s21 = smov 0  }
   0x6   :  { %s1658_s22 = smov 0   ;;  %s1660_s23 = smov 0  }
   0x7   :  { %s1662_s24 = smov 0   ;;  %s1664_s25 = smov 0  }
   0x8 LB: > { %s1293_s4 = sadd.s32 4294967295, %s1608_s25   ;;  %s42_s26 = sadd.s32 1, %s1596_s22  ;;  %s1608_s25 = sphi %s1664_s25, %s21_s25   ;;  %s1604_s24 = sphi %s1662_s24, %s2022_s24   ;;  %s1600_s23 = sphi %s1660_s23, %s2021_s23   ;;  %s1596_s22 = sphi %s1658_s22, %s2020_s22   ;;  %s1592_s21 = sphi %s1656_s21, %s2019_s21   ;;  %s1588_s20 = sphi %s1654_s20, %s2018_s20  }
   0x9   : > { %p49_p0 = scmp.ne.s32.totalorder %s1596_s22, %s1592_s21  ;;  %p50_p1 = scmp.eq.s32.totalorder %s1608_s25, 0 }
   0xa   : > { %p55_p2 = scmp.ne.s32.totalorder %s1592_s21, %s1588_s20  ;;  %p1688_p3 = scmp.eq.s32.totalorder %s1293_s4, 0 }
   0xb   : > { %p51_p4 = por %p50_p1, %p49_p0  ;;  %p1294_p5 = scmp.ge.s32.totalorder %s1608_s25, 1 }
   0xc   : > { %s2008_s27 = scalar_select %p1688_p3, 1, 0 }
   0xd   : > { %p1695_p6 = por %p1688_p3, %p55_p2  ;;  %p186_p7 = scmp.lt.s32.totalorder %s1608_s25, 5 }
   0xe   : > { %s1610_s30 = smov [#allocation6]   ;;  %p1358_p10 = scmp.lt.s32.totalorder %s1608_s25, 4 }
   0xf   : > { %s2009_s28 = scalar_select %p1695_p6, 1, 0 }
  0x10   : > { %p1700_p8 = pnand %p1294_p5, %p186_p7  ;;  %s202_s6 = sshll.u32 %s1610_s30, 4  ;;  %s203_s6 = int_to_ptr.vmem [resolvable:$true] %s202_s6 }
  0x11   : > { %p1713_p12 = pnand %p1358_p10, %p51_p4  ;;  %s1611_s9 = smov [#allocation8]  }
  0x12   : > { %s2010_s29 = scalar_select %p1700_p8, 1, 0 }
  0x13   : > { %p1341_p9 = pneg %p1700_p8  ;;  %s216_s10 = sshll.u32 %s1611_s9, 4  ;;  %s217_s10 = int_to_ptr.vmem [resolvable:$true] %s216_s10 }
  0x14   : > { %s2012_s8 = scalar_select %p1713_p12, 1, 0 }
  0x15   : > { %p1709_p11 = pnand %p1341_p9, %p1688_p3  ;;  %s1612_s11 = smov [#allocation9]  }
  0x16   : > { %s227_s12 = sshll.u32 %s1612_s11, 4  ;;  %s1436_s15 = scalar_lea.hbm %s1998_s1, 192  ;;  %s1741_s12 = int_to_ptr.vmem [resolvable:$true] %s227_s12 }
  0x17   : > { %p1437_p13 = scmp.ne.s32.totalorder %s1998_s1, %s1436_s15  ;;  %p1725_p0 = pneg %p1709_p11 }
  0x18   : > { %p1443_p4 = scmp.lt.u32.totalorder %s1436_s15, %s1998_s1 }
  0x19   : > { %p1439_p1 = pnand %p1725_p0, %p1437_p13 }
  0x1b   : > { %p1440_p2 = pneg %p1439_p1 }
  0x1d   : > { %p1445_p5 = pnand %p1443_p4, %p1440_p2 }
  0x1f   : > { %1448 = shalt.err (!%p1445_p5)
}
  0x20   : > { %s1449_s4 = scalar_lea.vmem %s203_s6, 192  ;;  %p1457_p3 = scmp.lt.s32.totalorder %s203_s6, %s203_s6 }
  0x21   : > { %p1450_p7 = scmp.ne.s32.totalorder %s203_s6, %s1449_s4  ;;  %p1458_p6 = scmp.lt.s32.totalorder %s1449_s4, %s1449_s4 }
  0x23   : > { %p1452_p9 = pnand %p1450_p7, %p1725_p0  ;;  %p1459_p8 = por %p1458_p6, %p1457_p3 }
  0x25   : > { %p1453_p10 = pneg %p1452_p9 }
  0x27   : > { %p1460_p12 = pnand %p1459_p8, %p1453_p10 }
  0x29   : > { %1463 = shalt.err (!%p1460_p12)
}
  0x2a   : > { %1344 = dma.hbm_to_vmem [thread:$0]  (!%p1709_p11), %s1998_s1, 192, %s203_s6, [#allocation7]  }
  0x2b   : > { %s1464_s14 = scalar_lea.hbm %s1999_s2, 192 }
  0x2c   : > { %p1465_p3 = scmp.ne.s32.totalorder %s1999_s2, %s1464_s14  ;;  %p1471_p12 = scmp.lt.u32.totalorder %s1464_s14, %s1999_s2 }
  0x2e   : > { %p1467_p6 = pnand %p1465_p3, %p1725_p0 }
  0x30   : > { %p1468_p8 = pneg %p1467_p6 }
  0x32   : > { %p1473_p13 = pnand %p1471_p12, %p1468_p8 }
  0x34   : > { %1476 = shalt.err (!%p1473_p13)
}
  0x35   : > { %s1477_s6 = scalar_lea.vmem %s217_s10, 192  ;;  %p1485_p5 = scmp.lt.s32.totalorder %s217_s10, %s217_s10 }
  0x36   : > { %p1478_p1 = scmp.ne.s32.totalorder %s217_s10, %s1477_s6  ;;  %p1486_p7 = scmp.lt.s32.totalorder %s1477_s6, %s1477_s6 }
  0x38   : > { %p1480_p2 = pnand %p1478_p1, %p1725_p0  ;;  %p1487_p9 = por %p1486_p7, %p1485_p5 }
  0x3a   : > { %p1481_p4 = pneg %p1480_p2 }
  0x3c   : > { %p1488_p10 = pnand %p1487_p9, %p1481_p4 }
  0x3e   : > { %1491 = shalt.err (!%p1488_p10)
}
  0x3f   : > { %1347 = dma.hbm_to_vmem [thread:$0]  (!%p1709_p11), %s1999_s2, 192, %s217_s10, [#allocation7]  }
  0x40   : > { %s1492_s11 = scalar_lea.hbm %s2000_s3, 384 }
  0x41   : > { %p1493_p3 = scmp.ne.s32.totalorder %s2000_s3, %s1492_s11  ;;  %p1499_p12 = scmp.lt.u32.totalorder %s1492_s11, %s2000_s3 }
  0x43   : > { %p1495_p6 = pnand %p1493_p3, %p1725_p0 }
  0x45   : > { %p1496_p8 = pneg %p1495_p6 }
  0x47   : > { %p1501_p13 = pnand %p1499_p12, %p1496_p8 }
  0x49   : > { %1504 = shalt.err (!%p1501_p13)
}
  0x4a   : > { %s1505_s10 = scalar_lea.vmem %s1741_s12, 384  ;;  %p1513_p5 = scmp.lt.s32.totalorder %s1741_s12, %s1741_s12 }
  0x4b   : > { %p1506_p1 = scmp.ne.s32.totalorder %s1741_s12, %s1505_s10  ;;  %p1514_p7 = scmp.lt.s32.totalorder %s1505_s10, %s1505_s10 }
  0x4d   : > { %p1508_p2 = pnand %p1506_p1, %p1725_p0  ;;  %p1515_p9 = por %p1514_p7, %p1513_p5 }
  0x4f   : > { %p1509_p4 = pneg %p1508_p2 }
  0x51   : > { %p1516_p10 = pnand %p1515_p9, %p1509_p4 }
  0x53   : > { %1519 = shalt.err (!%p1516_p10)
}
  0x54   : > { %1350 = dma.hbm_to_vmem [thread:$0]  (!%p1709_p11), %s2000_s3, 384, %s1741_s12, [#allocation10]  }
  0x55   : > { %s241_s18 = sand.u32 1, %s1596_s22   ;;  %s30_s6 = sadd.s32 1, %s1604_s24 }
  0x56   : > { %s1324_s20 = smul.u32 48, %s241_s18  ;;  %p31_p0 = scmp.ge.s32.totalorder %s30_s6, 4 }
  0x57   : > { %s1325_s4 = smul.u32 384, %s1604_s24  ;;  %s1803_s15 = scalar_lea.sflag [#allocation5], %s241_s18 }
  0x58   : > { %s2024_s6 = smov (%p31_p0, %s30_s6), 0  ;;  %s245_s11 = scalar_lea.vmem [#allocation4], %s1324_s20 }
  0x59   : > { %s1792_s9 = scalar_lea.hbm %s1997_s0, %s1325_s4  ;;  %s255_s12 = sshll.u32 %s245_s11, 4  ;;  %s1796_s12 = int_to_ptr.vmem [resolvable:$true] %s255_s12 }
  0x5a   : > { %s38_s13 = ssub.s32 %s1604_s24, %s2024_s6  ;;  %s1520_s16 = scalar_lea.hbm %s1792_s9, 768 }
  0x5b   : > { %p40_p11 = scmp.eq.s32.totalorder %s38_s13, 0  ;;  %p1521_p3 = scmp.ne.s32.totalorder %s1792_s9, %s1520_s16 }
  0x5c   : > { %p2014_p6 = scmp.ne.s32.totalorder %s2012_s8, 0  ;;  %s1525_s19 = scalar_lea.hbm %s1997_s0, 3072 }
  0x5d   : > { %s1801_s14 = scalar_select %p40_p11, %s1596_s22, %s42_s26  }
  0x5e   : > { %p1522_p8 = pneg %p2014_p6  ;;  %p1526_p1 = scmp.lt.u32.totalorder %s1792_s9, %s1997_s0 }
  0x5f   : > { %p1527_p2 = scmp.lt.u32.totalorder %s1525_s19, %s1520_s16  ;;  %p1529_p5 = scmp.lt.u32.totalorder %s1520_s16, %s1792_s9 }
  0x60   : > { %p1523_p12 = pnand %p1522_p8, %p1521_p3 }
  0x61   : > { %p1528_p4 = por %p1527_p2, %p1526_p1 }
  0x62   : > { %p1524_p13 = pneg %p1523_p12 }
  0x63   : > { %p1530_p7 = por %p1529_p5, %p1528_p4 }
  0x65   : > { %p1531_p9 = pnand %p1530_p7, %p1524_p13 }
  0x67   : > { %1534 = shalt.err (!%p1531_p9)
}
  0x68   : > { %s1535_s26 = scalar_lea.vmem %s1796_s12, 768  ;;  %s1613_s18 = smov [#allocation4]  }
  0x69   : > { %p1536_p10 = scmp.ne.s32.totalorder %s1796_s12, %s1535_s26  ;;  %s1540_s7 = sshll.u32 %s1613_s18, 4  ;;  %s1541_s7 = int_to_ptr.vmem [resolvable:$false] %s1540_s7 }
  0x6a   : > { %s1542_s30 = scalar_lea.vmem %s1541_s7, 1536  ;;  %p1543_p3 = scmp.lt.s32.totalorder %s1796_s12, %s1541_s7 }
  0x6b   : > { %p1538_p0 = pnand %p1536_p10, %p1522_p8  ;;  %p1544_p12 = scmp.lt.s32.totalorder %s1542_s30, %s1535_s26 }
  0x6d   : > { %p1539_p11 = pneg %p1538_p0  ;;  %p1545_p1 = por %p1544_p12, %p1543_p3 }
  0x6f   : > { %p1546_p2 = pnand %p1545_p1, %p1539_p11 }
  0x71   : > { %1549 = shalt.err (!%p1546_p2)
}
  0x72   : > { %s1614_s11 = smov 1536   ;;  %s1615_s13 = smov 384  }
  0x73   : > { %s1616_s16 = smov 24   ;;  %p2015_p8 = scmp.ne.s32.totalorder %s2010_s29, 0 }
  0x74   : > { %1354 = dma.hbm_to_vmem [thread:$0]  (!%p2014_p6), %s1792_s9, 768, %s1796_s12, %s1803_s15, %s1614_s11, %s1615_s13, %s1616_s16  }
  0x75   : > { %267 = sbr.rel (%p2015_p8) target bundleno = 426 (0x1aa), region = 40  ;;  %s269_s10 = sand.u32 (!%p2015_p8), 1, %s1592_s21  }
  0x76   : > { %s1326_s17 = smul.u32 (!%p2015_p8), 48, %s269_s10  ;;  %s270_s19 = scalar_lea.sflag (!%p2015_p8), [#allocation5], %s269_s10 }
  0x77   : > { %p2016_p13 = scmp.ne.s32.totalorder (!%p2015_p8), %s2009_s28, 0 }
  0x78   : > { %s1834_s20 = scalar_lea.vmem (!%p2015_p8), [#allocation4], %s1326_s17 }
  0x7c   : > { %1575 = dma.done.wait (%p2016_p13), %s270_s19, 768  }
  0x7d   : > { %1577 = vsyncadd (%p2016_p13), %s270_s19, 4294966528  ;;  %p2017_p4 = scmp.ne.s32.totalorder %s2008_s27, 0 }
  0x7f   : > { %1579 = dma.done.wait (%p2017_p4), [#allocation7], 384  }
  0x80   : > { %1581 = vsyncadd (%p2017_p4), [#allocation7], 4294966912 }
  0x81   : > { %1583 = dma.done.wait (%p2017_p4), [#allocation10], 384  }
  0x82   : > { %1585 = vsyncadd (%p2017_p4), [#allocation10], 4294966912  ;;  %p1304_p6 = scmp.ne.s32.totalorder %s1600_s23, 0 }
  0x83   : > { %v1617_v0 = vmov (!%p1304_p6), 4286644096  }
  0x84   : > { %320 = sbr.rel (%p1304_p6) target bundleno = 139 (0x8b), region = 60  ;;  %321 = vst [vmem:[#allocation2] sm:$0x3f] (!%p1304_p6), %v1617_v0 }
  0x8b PF: > { %v323_v1 = vld [vmem:[%s1834_s20] sm:$0xff]  ;;  %v324_v2 = vld [vmem:[%s1834_s20 + $0x8] sm:$0xff]  ;;  %v325_v3 = vld [vmem:[%s1834_s20 + $0x10] sm:$0xff]  ;;  %vm359_vm0 = vcmask 1043456   ;;  %vm696_vm1 = vcmask 1041409   ;;  %p1319_p5 = scmp.ne.s32.totalorder %s1600_s23, 3 }
  0x8c   : > { %v326_v4 = vld [vmem:[%s1834_s20 + $0x18] sm:$0xff]  ;;  %v1854_v5 = vld [vmem:[%s1834_s20 + $0x20] sm:$0xff]  ;;  %v1305_v6 = vcombine.low %v323_v1, %v323_v1  ;;  %v1306_v7 = vcombine.high %v323_v1, %v323_v1  ;;  %v1307_v8 = vcombine.low %v324_v2, %v324_v2  ;;  %v1308_v9 = vcombine.high %v324_v2, %v324_v2  ;;  %s1176_s23 = sld [smem:[#allocation3]] (!%p1319_p5) }
  0x8d   : > { %v1309_v10 = vcombine.low %v325_v3, %v325_v3  ;;  %v1310_v11 = vcombine.high %v325_v3, %v325_v3  ;;  %v1311_v12 = vcombine.low %v326_v4, %v326_v4  ;;  %v1312_v13 = vcombine.high %v326_v4, %v326_v4 }
  0x8e   : > { %v1313_v14 = vcombine.low %v1854_v5, %v1854_v5  ;;  %v1314_v15 = vcombine.high %v1854_v5, %v1854_v5  ;;  %v362_v16 = vsel %vm359_vm0, %v1305_v6, 4286644096  ;;  %v375_v17 = vsel %vm359_vm0, %v1306_v7, 4286644096 }
  0x8f   : > { %v388_v18 = vsel %vm359_vm0, %v1307_v8, 4286644096  ;;  %v364_v19 = vunpack.i.l.bf16 %v362_v16  ;;  %v365_v20 = vunpack.i.h.bf16 %v362_v16  ;;  %v377_v21 = vunpack.i.l.bf16 %v375_v17  ;;  %v328_v8 = vld [vmem:[%s1834_s20 + $0x28] sm:$0xff] }
  0x90   : > { %v378_v22 = vunpack.i.h.bf16 %v375_v17  ;;  %v390_v23 = vunpack.i.l.bf16 %v388_v18  ;;  %v391_v24 = vunpack.i.h.bf16 %v388_v18  ;;  %v401_v25 = vsel %vm359_vm0, %v1308_v9, 4286644096 }
  0x91   : > { %v414_v26 = vsel %vm359_vm0, %v1309_v10, 4286644096  ;;  %v366_v27 = vmax.f32 %v364_v19, %v365_v20  ;;  %v403_v29 = vunpack.i.l.bf16 %v401_v25  ;;  %v404_v30 = vunpack.i.h.bf16 %v401_v25 }
  0x92   : > { %v379_v28 = vmax.f32 %v377_v21, %v378_v22  ;;  %v392_v31 = vmax.f32 %v390_v23, %v391_v24  ;;  %v416_v32 = vunpack.i.l.bf16 %v414_v26  ;;  %v417_v33 = vunpack.i.h.bf16 %v414_v26 }
  0x93   : > { %v427_v34 = vsel %vm359_vm0, %v1310_v11, 4286644096  ;;  %v367_v35 = vrot.slane %v366_v27, 4  ;;  %v405_v37 = vmax.f32 %v403_v29, %v404_v30  ;;  %v440_v42 = vsel %vm359_vm0, %v1311_v12, 4286644096 }
  0x94   : > { %v380_v36 = vrot.slane %v379_v28, 4  ;;  %v429_v38 = vunpack.i.l.bf16 %v427_v34  ;;  %v393_v39 = vrot.slane %v392_v31, 4  ;;  %v418_v40 = vmax.f32 %v416_v32, %v417_v33 }
  0x95   : > { %v430_v41 = vunpack.i.h.bf16 %v427_v34  ;;  %v368_v43 = vmax.f32 %v366_v27, %v367_v35  ;;  %v406_v45 = vrot.slane %v405_v37, 4  ;;  %v442_v46 = vunpack.i.l.bf16 %v440_v42 }
  0x96   : > { %v381_v44 = vmax.f32 %v379_v28, %v380_v36  ;;  %v394_v47 = vmax.f32 %v392_v31, %v393_v39  ;;  %v419_v48 = vrot.slane %v418_v40, 4  ;;  %v443_v50 = vunpack.i.h.bf16 %v440_v42 }
  0x97   : > { %v431_v49 = vmax.f32 %v429_v38, %v430_v41  ;;  %v369_v51 = vrot.slane %v368_v43, 2  ;;  %v407_v53 = vmax.f32 %v405_v37, %v406_v45  ;;  %v453_v54 = vsel %vm359_vm0, %v1312_v13, 4286644096 }
  0x98   : > { %v382_v52 = vrot.slane %v381_v44, 2  ;;  %v395_v55 = vrot.slane %v394_v47, 2  ;;  %v420_v56 = vmax.f32 %v418_v40, %v419_v48  ;;  %v444_v58 = vmax.f32 %v442_v46, %v443_v50 }
  0x99   : > { %v432_v57 = vrot.slane %v431_v49, 4  ;;  %v370_v59 = vmax.f32 %v368_v43, %v369_v51  ;;  %v408_v61 = vrot.slane %v407_v53, 2  ;;  %v455_v62 = vunpack.i.l.bf16 %v453_v54 }
  0x9a   : > { %v383_v60 = vmax.f32 %v381_v44, %v382_v52  ;;  %v396_v63 = vmax.f32 %v394_v47, %v395_v55  ;;  %v421_v0 = vrot.slane %v420_v56, 2  ;;  %v445_v2 = vrot.slane %v444_v58, 4 }
  0x9b   : > { %v433_v1 = vmax.f32 %v431_v49, %v432_v57  ;;  %v371_v3 = vrot.slane %v370_v59, 1  ;;  %v409_v6 = vmax.f32 %v407_v53, %v408_v61  ;;  %v456_v7 = vunpack.i.h.bf16 %v453_v54 }
  0x9c   : > { %v384_v4 = vrot.slane %v383_v60, 1  ;;  %v397_v9 = vrot.slane %v396_v63, 1  ;;  %v422_v10 = vmax.f32 %v420_v56, %v421_v0  ;;  %v446_v12 = vmax.f32 %v444_v58, %v445_v2 }
  0x9d   : > { %v434_v11 = vrot.slane %v433_v1, 2  ;;  %v372_v13 = vmax.f32 %v370_v59, %v371_v3  ;;  %v410_v17 = vrot.slane %v409_v6, 1  ;;  %v457_v18 = vmax.f32 %v455_v62, %v456_v7 }
  0x9e   : > { %v385_v16 = vmax.f32 %v383_v60, %v384_v4  ;;  %v398_v19 = vmax.f32 %v396_v63, %v397_v9  ;;  %v423_v20 = vrot.slane %v422_v10, 1  ;;  %v447_v22 = vrot.slane %v446_v12, 2 }
  0x9f   : > { %v435_v21 = vmax.f32 %v433_v1, %v434_v11  ;;  %v1315_v23 = vcombine.low %v328_v8, %v328_v8  ;;  %v1316_v24 = vcombine.high %v328_v8, %v328_v8  ;;  %v458_v25 = vrot.slane %v457_v18, 4 }
  0xa0   : > { %v535_v26 = vlaneseq  ;;  %v373_v27 = vpack.i.bf16 %v372_v13, %v372_v13  ;;  %v386_v28 = vpack.i.bf16 %v385_v16, %v385_v16  ;;  %v448_v30 = vmax.f32 %v446_v12, %v447_v22 }
  0xa1   : > { %v436_v29 = vrot.slane %v435_v21, 1  ;;  %v411_v31 = vmax.f32 %v409_v6, %v410_v17  ;;  %v459_v32 = vmax.f32 %v457_v18, %v458_v25  ;;  %v466_v33 = vsel %vm359_vm0, %v1313_v14, 4286644096 }
  0xa2   : > { %v479_v34 = vsel %vm359_vm0, %v1314_v15, 4286644096  ;;  %v399_v35 = vpack.i.bf16 %v398_v19, %v398_v19  ;;  %v424_v36 = vmax.f32 %v422_v10, %v423_v20  ;;  %v449_v37 = vrot.slane %v448_v30, 1 }
  0xa3   : > { %v468_v38 = vunpack.i.l.bf16 %v466_v33  ;;  %v460_v39 = vrot.slane %v459_v32, 2  ;;  %v469_v40 = vunpack.i.h.bf16 %v466_v33  ;;  %v481_v41 = vunpack.i.l.bf16 %v479_v34 }
  0xa4   : > { %v482_v42 = vunpack.i.h.bf16 %v479_v34  ;;  %v437_v43 = vmax.f32 %v435_v21, %v436_v29  ;;  %v450_v44 = vmax.f32 %v448_v30, %v449_v37  ;;  %v492_v45 = vsel %vm359_vm0, %v1315_v23, 4286644096 }
  0xa5   : > { %v505_v46 = vsel %vm359_vm0, %v1316_v24, 4286644096  ;;  %v461_v14 = vmax.f32 %v459_v32, %v460_v39  ;;  %v470_v47 = vmax.f32 %v468_v38, %v469_v40  ;;  %v494_v5 = vunpack.i.l.bf16 %v492_v45 }
  0xa6   : > { %v483_v48 = vmax.f32 %v481_v41, %v482_v42  ;;  %v412_v49 = vpack.i.bf16 %v411_v31, %v411_v31  ;;  %v495_v15 = vunpack.i.h.bf16 %v492_v45  ;;  %v507_v50 = vunpack.i.l.bf16 %v505_v46 }
  0xa7   : > { %v508_v51 = vunpack.i.h.bf16 %v505_v46  ;;  %v425_v52 = vpack.i.bf16 %v424_v36, %v424_v36  ;;  %v462_v53 = vrot.slane %v461_v14, 1  ;;  %v471_v54 = vrot.slane %v470_v47, 4 }
  0xa8   : > { %v484_v55 = vrot.slane %v483_v48, 4  ;;  %v438_v56 = vpack.i.bf16 %v437_v43, %v437_v43  ;;  %v451_v57 = vpack.i.bf16 %v450_v44, %v450_v44  ;;  %v496_v58 = vmax.f32 %v494_v5, %v495_v15 }
  0xa9   : > { %v509_v59 = vmax.f32 %v507_v50, %v508_v51  ;;  %v463_v60 = vmax.f32 %v461_v14, %v462_v53  ;;  %v472_v61 = vmax.f32 %v470_v47, %v471_v54  ;;  %v1618_v1 = vmov 1966171168  }
  0xaa   : > { %v485_v62 = vmax.f32 %v483_v48, %v484_v55  ;;  %v497_v63 = vrot.slane %v496_v58, 4  ;;  %v533_v2 = vunpack.c.l.s4 %v1618_v1  ;;  %v1879_v3 = vshrl.u32 %v535_v26, 7 }
  0xab   : > { %v510_v0 = vrot.slane %v509_v59, 4  ;;  %v473_v4 = vrot.slane %v472_v61, 2  ;;  %v529_v7 = vcombine.low %v373_v27, %v386_v28  ;;  %v530_v8 = vcombine.low %v399_v35, %v412_v49 }
  0xac   : > { %v486_v6 = vrot.slane %v485_v62, 2  ;;  %v498_v9 = vmax.f32 %v496_v58, %v497_v63  ;;  %v534_v11 = vunpack.c.0.s8 %v533_v2  ;;  %v464_v12 = vpack.i.bf16 %v463_v60, %v463_v60 }
  0xad   : > { %v511_v10 = vmax.f32 %v509_v59, %v510_v0  ;;  %v474_v13 = vmax.f32 %v472_v61, %v473_v4  ;;  %v531_v17 = vcombine.low %v425_v52, %v438_v56  ;;  %v1619_v23 = vmov 1935823168  }
  0xae   : > { %v487_v16 = vmax.f32 %v485_v62, %v486_v6  ;;  %v499_v18 = vrot.slane %v498_v9, 2  ;;  %v1882_v20 = vsub.s32 %v534_v11, %v1879_v3  ;;  %v611_v24 = vunpack.c.l.s4 %v1619_v23 }
  0xaf   : > { %v512_v19 = vrot.slane %v511_v10, 2  ;;  %v475_v21 = vrot.slane %v474_v13, 1  ;;  %v569_v32 = vcombine.low %v451_v57, %v464_v12  ;;  %vm890_vm2 = vcmask (!%p1319_p5), 1041408  }
  0xb0   : > { %v488_v22 = vrot.slane %v487_v16, 1  ;;  %v500_v25 = vmax.f32 %v498_v9, %v499_v18  ;;  %v538_v27 = vrot.slane %v529_v7, %v1882_v20  ;;  %v545_v28 = vrot.slane %v530_v8, %v1882_v20 }
  0xb1   : > { %v513_v26 = vmax.f32 %v511_v10, %v512_v19  ;;  %v476_v29 = vmax.f32 %v474_v13, %v475_v21  ;;  %v552_v31 = vrot.slane %v531_v17, %v1882_v20  ;;  %v612_v39 = vunpack.c.0.s8 %v611_v24 }
  0xb2   : > { %v489_v30 = vmax.f32 %v487_v16, %v488_v22  ;;  %v501_v33 = vrot.slane %v500_v25, 1  ;;  %v553_v35 = vcombine.low %v538_v27, %v545_v28  ;;  %v578_v44 = vrot.slane %v569_v32, %v1882_v20 }
  0xb3   : > { %v514_v34 = vrot.slane %v513_v26, 1  ;;  %v477_v36 = vpack.i.bf16 %v476_v29, %v476_v29  ;;  %v567_v38 = vrot.slane %v552_v31, %v1882_v20  ;;  %v615_v5 = vsub.s32 %v612_v39, %v1879_v3 }
  0xb4   : > { %v490_v37 = vpack.i.bf16 %v489_v30, %v489_v30  ;;  %v502_v40 = vmax.f32 %v500_v25, %v501_v33  ;;  %v560_v42 = vrot.slane %v553_v35, %v1882_v20  ;;  %vm1185_vm3 = vcmask (!%p1319_p5), 1024  }
  0xb5   : > { %v515_v41 = vmax.f32 %v513_v26, %v514_v34  ;;  %v1317_v48 = vcombine.low %v567_v38, %v567_v38 }
  0xb6   : > { %v570_v43 = vcombine.low %v477_v36, %v490_v37  ;;  %v503_v45 = vpack.i.bf16 %v502_v40, %v502_v40  ;;  %v568_v14 = vcombine.low %v560_v42, %v567_v38 }
  0xb7   : > { %v516_v46 = vpack.i.bf16 %v515_v41, %v515_v41  ;;  %v623_v53 = vrot.slane %v1317_v48, %v615_v5  ;;  %v322_v41 = vld [vmem:[#allocation2] sm:$0x3f]  ;;  %v774_v48 = vsub.s32 (!%p1319_p5), 4, %v1879_v3 }
  0xb8   : > { %v585_v47 = vrot.slane %v570_v43, %v1882_v20  ;;  %v616_v50 = vrot.slane %v568_v14, %v615_v5 }
  0xb9   : > { %v571_v49 = vcombine.low %v503_v45, %v516_v46  ;;  %v645_v59 = vrot.slane %v623_v53, %v615_v5  ;;  %v1909_v45 = vld [vmem:[#allocation9 + $0x8] sm:$0x77] (!%p1319_p5)  ;;  %v1911_v46 = vld [vmem:[#allocation9 + $0x10] sm:$0x77] (!%p1319_p5) }
  0xba   : > { %v593_v15 = vcombine.low %v578_v44, %v585_v47  ;;  %v624_v55 = vcombine.high %v616_v50, %v616_v50  ;;  %v631_v58 = vrot.slane %v616_v50, %v615_v5  ;;  %v1907_v44 = vld [vmem:[#allocation9] sm:$0x77] (!%p1319_p5)  ;;  %v770_v47 = vsub.s32 (!%p1319_p5), 0, %v1879_v3 }
  0xbb   : > { %v592_v51 = vrot.slane %v571_v49, %v1882_v20  ;;  %v687_v6 = vunpack.c.l.b16 %v645_v59  ;;  %v688_v13 = vunpack.c.h.b16 %v645_v59  ;;  %v1620_v49 = vmov (!%p1319_p5), 1983009808  }
  0xbc   : > { %v600_v52 = vrot.slane %v593_v15, %v1882_v20  ;;  %v638_v62 = vrot.slane %v624_v55, %v615_v5  ;;  %v683_v2 = vunpack.c.l.b16 %v631_v58  ;;  %v684_v4 = vunpack.c.h.b16 %v631_v58 }
  0xbd   : > { %v607_v54 = vrot.slane %v592_v51, %v1882_v20  ;;  %v831_v15 = vunpack.c.l.s4 (!%p1319_p5), %v1620_v49  ;;  %v771_v50 = vrot.slane (!%p1319_p5), %v1907_v44, %v770_v47  ;;  %v775_v51 = vrot.slane (!%p1319_p5), %v1907_v44, %v774_v48 }
  0xbe   : > { %v685_v11 = vunpack.c.l.b16 %v638_v62  ;;  %v686_v12 = vunpack.c.h.b16 %v638_v62  ;;  %v783_v53 = vrot.slane (!%p1319_p5), %v1909_v45, %v774_v48  ;;  %v791_v55 = vrot.slane (!%p1319_p5), %v1911_v46, %v774_v48 }
  0xbf   : > { %v608_v56 = vcombine.low %v600_v52, %v607_v54  ;;  %v1318_v57 = vcombine.low %v607_v54, %v607_v54  ;;  %v779_v52 = vrot.slane (!%p1319_p5), %v1909_v45, %v770_v47  ;;  %v787_v54 = vrot.slane (!%p1319_p5), %v1911_v46, %v770_v47 }
  0xc0   : > { %v801_v58 = vrot.slane (!%p1319_p5), %v771_v50, %v770_v47  ;;  %v805_v59 = vrot.slane (!%p1319_p5), %v775_v51, %v770_v47 }
  0xc1   : > { %v653_v60 = vrot.slane %v608_v56, %v615_v5  ;;  %v660_v61 = vrot.slane %v1318_v57, %v615_v5  ;;  %v832_v56 = vunpack.c.0.s8 (!%p1319_p5), %v831_v15  ;;  %v906_v57 = vsub.s32 (!%p1319_p5), 1, %v1879_v3 }
  0xc2   : > { %v817_v62 = vrot.slane (!%p1319_p5), %v787_v54, %v770_v47 }
  0xc3   : > { %v661_v63 = vcombine.high %v653_v60, %v653_v60  ;;  %v668_v0 = vrot.slane %v653_v60, %v615_v5  ;;  %v682_v1 = vrot.slane %v660_v61, %v615_v5  ;;  %v809_v60 = vrot.slane (!%p1319_p5), %v779_v52, %v770_v47 }
  0xc4   : > { %v813_v61 = vrot.slane (!%p1319_p5), %v783_v53, %v770_v47 }
  0xc5   : > { %v675_v7 = vrot.slane %v661_v63, %v615_v5  ;;  %v689_v8 = vunpack.c.l.b16 %v668_v0  ;;  %v690_v9 = vunpack.c.h.b16 %v668_v0  ;;  %v693_v10 = vunpack.c.l.b16 %v682_v1 }
  0xc6   : > { %v694_v16 = vunpack.c.h.b16 %v682_v1  ;;  %v821_v63 = vrot.slane (!%p1319_p5), %v791_v55, %v770_v47  ;;  %v1923_v0 = vsub.s32 (!%p1319_p5), %v832_v56, %v1879_v3  ;;  %v907_v1 = vrot.slane (!%p1319_p5), %v1907_v44, %v906_v57 }
  0xc7   : > { %v691_v17 = vunpack.c.l.b16 %v675_v7  ;;  %v692_v18 = vunpack.c.h.b16 %v675_v7  ;;  %v695_v19 = vrot.slane %v689_v8, 7  ;;  %v698_v21 = vrot.slane %v690_v9, 7 }
  0xc8   : > { %v704_v22 = vrot.slane %v693_v10, 7  ;;  %v706_v23 = vrot.slane %v694_v16, 7  ;;  %v915_v7 = vrot.slane (!%p1319_p5), %v1909_v45, %v906_v57  ;;  %v845_v8 = vcombine.low (!%p1319_p5), %v817_v62, %v821_v63 }
  0xc9   : > { %v697_v24 = vsel %vm696_vm1, %v695_v19, %v683_v2  ;;  %v699_v25 = vsel %vm696_vm1, %v698_v21, %v684_v4  ;;  %v700_v26 = vrot.slane %v691_v17, 7  ;;  %v702_v27 = vrot.slane %v692_v18, 7 }
  0xca   : > { %v705_v28 = vsel %vm696_vm1, %v704_v22, %v687_v6  ;;  %v707_v29 = vsel %vm696_vm1, %v706_v23, %v688_v13  ;;  %v708_v30 = vpack.c.b16 %v699_v25, %v697_v24  ;;  %v828_v2 = vcombine.low (!%p1319_p5), %v801_v58, %v805_v59 }
  0xcb   : > { %v701_v31 = vsel %vm696_vm1, %v700_v26, %v685_v11  ;;  %v703_v32 = vsel %vm696_vm1, %v702_v27, %v686_v12  ;;  %v710_v33 = vpack.c.b16 %v707_v29, %v705_v28  ;;  %v829_v4 = vcombine.low (!%p1319_p5), %v809_v60, %v813_v61 }
  0xcc   : > { %v709_v34 = vpack.c.b16 %v703_v32, %v701_v31  ;;  %v717_v35 = vrot.slane %v708_v30, %v1882_v20  ;;  %v910_v6 = vsub.s32 (!%p1319_p5), 5, %v1879_v3  ;;  %v923_v9 = vrot.slane (!%p1319_p5), %v1911_v46, %v906_v57 }
  0xcd   : > { %v731_v36 = vrot.slane %v710_v33, %v1882_v20  ;;  %v937_v10 = vrot.slane (!%p1319_p5), %v907_v1, %v906_v57  ;;  %v1042_v11 = vsub.s32 (!%p1319_p5), 2, %v1879_v3  ;;  %v836_v12 = vrot.slane (!%p1319_p5), %v828_v2, %v1923_v0 }
  0xce   : > { %v724_v37 = vrot.slane %v709_v34, %v1882_v20  ;;  %v843_v13 = vrot.slane (!%p1319_p5), %v829_v4, %v1923_v0  ;;  %v911_v16 = vrot.slane (!%p1319_p5), %v1907_v44, %v910_v6  ;;  %v919_v17 = vrot.slane (!%p1319_p5), %v1909_v45, %v910_v6 }
  0xcf   : > { %v746_v39 = vrot.slane %v731_v36, %v1882_v20  ;;  %v852_v18 = vrot.slane (!%p1319_p5), %v845_v8, %v1923_v0  ;;  %v927_v19 = vrot.slane (!%p1319_p5), %v1911_v46, %v910_v6  ;;  %v945_v21 = vrot.slane (!%p1319_p5), %v915_v7, %v906_v57 }
  0xd0   : > { %v732_v38 = vcombine.low %v717_v35, %v724_v37  ;;  %v953_v22 = vrot.slane (!%p1319_p5), %v923_v9, %v906_v57  ;;  %v844_v23 = vcombine.low (!%p1319_p5), %v836_v12, %v843_v13  ;;  %v941_v24 = vrot.slane (!%p1319_p5), %v911_v16, %v906_v57 }
  0xd1   : > { %v949_v25 = vrot.slane (!%p1319_p5), %v919_v17, %v906_v57  ;;  %v957_v27 = vrot.slane (!%p1319_p5), %v927_v19, %v906_v57  ;;  %v1046_v28 = vsub.s32 (!%p1319_p5), 6, %v1879_v3  ;;  %v1043_v33 = vrot.slane (!%p1319_p5), %v1907_v44, %v1042_v11 }
  0xd2   : > { %v739_v40 = vrot.slane %v732_v38, %v1882_v20  ;;  %754 = sbr.rel (%p1319_p5) target bundleno = 426 (0x1aa), region = 64  ;;  %v964_v30 = vcombine.low (!%p1319_p5), %v937_v10, %v941_v24  ;;  %v1051_v35 = vrot.slane (!%p1319_p5), %v1909_v45, %v1042_v11  ;;  %v762_v38 = vld [vmem:[#allocation6 + $0x8] sm:$0xf] (!%p1319_p5) }
  0xd3   : > { %v965_v31 = vcombine.low (!%p1319_p5), %v945_v21, %v949_v25  ;;  %v981_v32 = vcombine.low (!%p1319_p5), %v953_v22, %v957_v27  ;;  %v1047_v34 = vrot.slane (!%p1319_p5), %v1907_v44, %v1046_v28  ;;  %v1063_v49 = vrot.slane (!%p1319_p5), %v1911_v46, %v1046_v28  ;;  %v764_v21 = vld [vmem:[#allocation8 + $0x8] sm:$0xf] (!%p1319_p5) }
  0xd4   : > { %v747_v42 = vcombine.low %v739_v40, %v746_v39  ;;  %v972_v39 = vrot.slane (!%p1319_p5), %v964_v30, %v1923_v0  ;;  %v1073_v15 = vrot.slane (!%p1319_p5), %v1043_v33, %v1042_v11  ;;  %v1081_v56 = vrot.slane (!%p1319_p5), %v1051_v35, %v1042_v11 }
  0xd5   : > { %v979_v40 = vrot.slane (!%p1319_p5), %v965_v31, %v1923_v0  ;;  %v1077_v50 = vrot.slane (!%p1319_p5), %v1047_v34, %v1042_v11  ;;  %v1093_v1 = vrot.slane (!%p1319_p5), %v1063_v49, %v1042_v11 }
  0xd6   : > { %v749_v43 = vmax.bf16 %v747_v42, %v322_v41  ;;  %v761_v41 = vld [vmem:[#allocation6] sm:$0xff] (!%p1319_p5)  ;;  %v988_v42 = vrot.slane (!%p1319_p5), %v981_v32, %v1923_v0 }
  0xd7   : > { %v1100_v7 = vcombine.low (!%p1319_p5), %v1073_v15, %v1077_v50 }
  0xd8   : > { %750 = vst [vmem:[#allocation2] sm:$0x3f] %v749_v43  ;;  %v1055_v43 = vrot.slane (!%p1319_p5), %v1909_v45, %v1046_v28 }
  0xda   : > { %v1085_v57 = vrot.slane %v1055_v43, %v1042_v11 }
  0xdc   : > { %v1101_v10 = vcombine.low %v1081_v56, %v1085_v57 }
  0xde   : > { %v1115_v22 = vrot.slane %v1101_v10, %v1923_v0 }
  0xdf   : > { %v758_v14 = vld [vmem:[#allocation2] sm:$0x3f] }
  0xe0   : > { %v759_v5 = vunpack.c.l.bf16 %v758_v14  ;;  %v760_v20 = vunpack.c.h.bf16 %v758_v14  ;;  %v1059_v14 = vrot.slane %v1911_v46, %v1042_v11 }
  0xe2   : > { %v856_v26 = vmul.f32 %v852_v18, %v760_v20  ;;  %v855_v29 = vmul.f32 %v844_v23, %v759_v5  ;;  %v980_v5 = vcombine.low %v972_v39, %v979_v40  ;;  %v992_v20 = vmul.f32 %v988_v42, %v762_v38 }
  0xe3   : > { %v1089_v61 = vrot.slane %v1059_v14, %v1042_v11  ;;  %v1108_v18 = vrot.slane %v1100_v7, %v1923_v0 }
  0xe4   : > { %v859_v36 = vcombine.high %v855_v29, %v855_v29  ;;  %v866_v37 = vrot.slane %v855_v29, %v1923_v0  ;;  %v882_v3 = vrot.slane %v856_v26, %v1923_v0  ;;  %v991_v54 = vmul.f32 %v980_v5, %v761_v41  ;;  %v763_v26 = vld [vmem:[#allocation8] sm:$0xff] }
  0xe5   : > { %v1018_v63 = vrot.slane %v992_v20, %v1923_v0  ;;  %v1117_v12 = vcombine.low %v1089_v61, %v1093_v1  ;;  %v1116_v29 = vcombine.low %v1108_v18, %v1115_v22 }
  0xe6   : > { %v873_v44 = vrot.slane %v859_v36, %v1923_v0  ;;  %v874_v47 = vcombine.high %v866_v37, %v866_v37  ;;  %v891_v48 = vsel %vm890_vm2, %v866_v37, 0.0  ;;  %v883_v45 = vcombine.high %v882_v3, %v882_v3 }
  0xe7   : > { %v995_v59 = vcombine.high %v991_v54, %v991_v54  ;;  %v1002_v60 = vrot.slane %v991_v54, %v1923_v0  ;;  %v898_v46 = vsel %vm890_vm2, %v882_v3, 0.0  ;;  %v1124_v23 = vrot.slane %v1117_v12, %v1923_v0 }
  0xe8   : > { %v875_v51 = vcombine.high %v873_v44, %v873_v44  ;;  %v892_v52 = vsel %vm890_vm2, %v874_v47, 0.0  ;;  %v894_v53 = vsel %vm890_vm2, %v873_v44, 0.0  ;;  %v900_v9 = vsel %vm890_vm2, %v883_v45, 0.0 }
  0xe9   : > { %v893_v55 = vadd.f32 %v892_v52, %v891_v48  ;;  %v1009_v2 = vrot.slane %v995_v59, %v1923_v0  ;;  %v1010_v4 = vcombine.high %v1002_v60, %v1002_v60  ;;  %v1026_v6 = vsel %vm890_vm2, %v1002_v60, 0.0 }
  0xea   : > { %v896_v58 = vsel %vm890_vm2, %v875_v51, 0.0  ;;  %v1019_v24 = vcombine.high %v1018_v63, %v1018_v63  ;;  %v1033_v30 = vsel %vm890_vm2, %v1018_v63, 0.0  ;;  %v1128_v31 = vmul.f32 %v1124_v23, %v764_v21 }
  0xeb   : > { %v895_v62 = vadd.f32 %v894_v53, %v893_v55  ;;  %v1011_v13 = vcombine.high %v1009_v2, %v1009_v2  ;;  %v1027_v16 = vsel %vm890_vm2, %v1010_v4, 0.0  ;;  %v1029_v17 = vsel %vm890_vm2, %v1009_v2, 0.0 }
  0xec   : > { %v1028_v11 = vadd.f32 %v1027_v16, %v1026_v6  ;;  %v1127_v33 = vmul.f32 %v1116_v29, %v763_v26  ;;  %v1035_v34 = vsel %vm890_vm2, %v1019_v24, 0.0  ;;  %v1154_v38 = vrot.slane %v1128_v31, %v1923_v0 }
  0xed   : > { %v897_v8 = vadd.f32 %v896_v58, %v895_v62  ;;  %v1031_v25 = vsel %vm890_vm2, %v1011_v13, 0.0  ;;  %v1177_v54 = vstv %s1176_s23 }
  0xee   : > { %v1030_v28 = vadd.f32 %v1029_v17, %v1028_v11  ;;  %v1131_v36 = vcombine.high %v1127_v33, %v1127_v33  ;;  %v1138_v37 = vrot.slane %v1127_v33, %v1923_v0  ;;  %v1155_v47 = vcombine.high %v1154_v38, %v1154_v38 }
  0xef   : > { %v899_v19 = vadd.f32 %v898_v46, %v897_v8  ;;  %v1169_v20 = vsel %vm890_vm2, %v1154_v38, 0.0 }
  0xf0   : > { %v1032_v32 = vadd.f32 %v1031_v25, %v1030_v28  ;;  %v1145_v40 = vrot.slane %v1131_v36, %v1923_v0  ;;  %v1146_v3 = vcombine.high %v1138_v37, %v1138_v37  ;;  %v1162_v41 = vsel %vm890_vm2, %v1138_v37, 0.0 }
  0xf1   : > { %v901_v27 = vadd.f32 %v900_v9, %v899_v19  ;;  %v1171_v15 = vsel %vm890_vm2, %v1155_v47, 0.0 }
  0xf2   : > { %v1034_v35 = vadd.f32 %v1033_v30, %v1032_v32  ;;  %v1147_v42 = vcombine.high %v1145_v40, %v1145_v40  ;;  %v1163_v43 = vsel %vm890_vm2, %v1146_v3, 0.0  ;;  %v1165_v14 = vsel %vm890_vm2, %v1145_v40, 0.0 }
  0xf3   : > { %902 = vadd.xlane.f32.xlu0 %v901_v27  ;;  %v1164_v44 = vadd.f32 %v1163_v43, %v1162_v41 }
  0xf4   : > { %v1036_v39 = vadd.f32 %v1035_v34, %v1034_v35  ;;  %v1167_v48 = vsel %vm890_vm2, %v1147_v42, 0.0 }
  0xf5   : > { %v1166_v5 = vadd.f32 %v1165_v14, %v1164_v44 }
  0xf7   : > { %1037 = vadd.xlane.f32.xlu0 %v1036_v39  ;;  %v1168_v49 = vadd.f32 %v1167_v48, %v1166_v5 }
  0xf9   : > { %v1170_v0 = vadd.f32 %v1169_v20, %v1168_v49 }
  0xfb   : > { %v1172_v50 = vadd.f32 %v1171_v15, %v1170_v0 }
  0xfd   : > { %1173 = vadd.xlane.f32.xlu1 %v1172_v50 }
 0x180   : > { %v903_v51 = vpop.xlane.xlu0 %902 }
 0x184   : > { %v1038_v52 = vpop.xlane.xlu0 %1037 }
 0x185   : > { %v1039_v53 = vadd.f32 %v1038_v52, %v903_v51 }
 0x18a   : > { %v1174_v45 = vpop.xlane.xlu1 %1173 }
 0x18b   : > { %v1175_v55 = vadd.f32 %v1174_v45, %v1039_v53 }
 0x18d   : > { %v1178_v56 = vadd.f32 %v1177_v54, %v1175_v55 }
 0x18f   : > { %v1320_v57 = vmul.f32 -1.442695, %v1178_v56 }
 0x191   : > { %1432 = vpow2.f32 %v1320_v57 }
 0x19b   : > { %v1433_v58 = vpop.eup %1432 }
 0x19c   : > { %v1182_v59 = vadd.f32 1.0, %v1433_v58 }
 0x19e   : > { %1434 = vrcp.f32 %v1182_v59 }
 0x1a8   : > { %v1435_v60 = vpop.eup %1434 }
 0x1a9   : > { %1186 = vst.msk [vmem:[%s2002_s5] sm:$0x3] %vm1185_vm3, %v1435_v60 }
 0x1aa PF: > { %s21_s25 = sadd.s32 1, %s1608_s25   ;;  %s2018_s20 = smov %s1592_s21 }
 0x1ab   : > { %p18_p7 = scmp.ge.s32.totalorder %s21_s25, 6   ;;  %s2019_s21 = smov %s1596_s22 }
 0x1ac   : > { %s2020_s22 = smov %s1801_s14  ;;  %s2021_s23 = smov %s1604_s24 }
 0x1ad   : > { %s2022_s24 = smov %s2024_s6  ;;  %20 = sbr.rel (!%p18_p7) target bundleno = 8 (0x8), region = 102 }
 0x1b4   :  { %1206 = vsyncpa [#allocation5], 1 }
 0x1b5   :  { %1208 = vsyncpa [#allocation5 + $0x1], 1 }
 0x1b6   :  { %1209 = vsyncpa [#allocation7], 1 }
 0x1b7   :  { %1210 = vsyncpa [#allocation10], 1 }

</bundles_post_ra>
